<compile_context>
chip_gen: v6e
topology: v6e:2x2x1
jax: 0.10.0
libtpu: 0.0.40
codegen_flags: <defaults>
</compile_context>

<pallas_src>
import functools

import jax
import jax.numpy as jnp
from jax.experimental import pallas as pl
from jax.experimental.pallas import tpu as pltpu

_MIB = 1024 * 1024


def _vmem_budgets():
    """(per-block budget, vmem_limit_bytes) sized to the running chip."""
    try:
        cap = getattr(pltpu.get_tpu_info(), "vmem_capacity_bytes", 64 * _MIB)
    except Exception:  # pragma: no cover - conservative (v7x-class) fallback
        cap = 64 * _MIB
    if cap <= 64 * _MIB:                 # v7x: 64 MiB per TensorCore
        return 8 * _MIB, 48 * _MIB
    return 16 * _MIB, 64 * _MIB          # v5e / v6e: 128 MiB physical VMEM


def _pick_spatial_tile(n, chans, itemsize, budget, max_lanes):
    """Lane width TN for a (chans, TN) block.

    Largest multiple of 128 keeping the block under `budget` bytes (capped at
    `max_lanes`); if the full row is smaller and not 128-divisible, fall back
    to the (always legal) full extent.  Tiles that don't divide N use a cdiv
    grid with in-kernel masking, so blocks stay bounded on every generation.
    """
    by_budget = (budget // max(1, chans * itemsize)) // 128 * 128
    cap = max(128, min(by_budget, max_lanes))
    if n % 128 == 0:
        return min(cap, n)
    if n > cap:
        return cap                       # cdiv grid; overhang columns masked
    return n                             # small awkward N: full-extent last dim


def _gap_partial_sum_kernel(x_ref, psum_ref, acc_ref, *,
                            tiles_per_split, tn, n_total, needs_mask):
    """x_ref: (1, Cin, TN) spatial tile; psum_ref: (1, 1, Cin, 1) partial sum;
    acc_ref: (Cin, 128) lane-dense f32 accumulator (VMEM scratch)."""
    s = pl.program_id(1)
    j = pl.program_id(2)

    @pl.when(j == 0)
    def _():
        acc_ref[...] = jnp.zeros_like(acc_ref)

    n_chunks = tn // 128
    rem = tn % 128
    for k in range(n_chunks):
        chunk = x_ref[0, :, k * 128:(k + 1) * 128].astype(jnp.float32)
        if needs_mask:
            base = (s * tiles_per_split + j) * tn + k * 128
            col = jax.lax.broadcasted_iota(jnp.int32, (1, 128), 1) + base
            chunk = jnp.where(col < n_total, chunk, 0.0)
        acc_ref[...] += chunk            # plain VPU adds; no per-tile XLU reduce
    if rem:                              # only for the full-extent fallback TN
        acc_ref[:, :rem] += x_ref[0, :, n_chunks * 128:tn].astype(jnp.float32)

    @pl.when(j == pl.num_programs(2) - 1)
    def _():
        # One cross-lane reduce per (batch, split): (Cin, 128) -> (Cin, 1).
        psum_ref[0, 0] = jnp.sum(acc_ref[...], axis=-1, keepdims=True)


def _combine_broadcast_kernel(psum_ref, w_ref, scale_ref, shift_ref, o_ref,
                              ybc_ref, *, inv_n):
    """psum_ref: (1, NSPLIT, Cin, 1); w_ref: (Cout, Cin); scale/shift: (Cout, 1);
    o_ref: (1, Cout, TN_OUT); ybc_ref: (Cout, TN_OUT) VMEM scratch (out dtype)."""

    @pl.when(pl.program_id(2) == 0)
    def _():
        pooled = psum_ref[0, 0]
        for si in range(1, psum_ref.shape[1]):            # combine spatial splits
            pooled = pooled + psum_ref[0, si]
        pooled = pooled * inv_n                            # (Cin, 1) global mean
        proj = jnp.dot(w_ref[...], pooled,
                       preferred_element_type=jnp.float32)  # 1x1 conv (MXU, idle)
        y = jnp.maximum(proj * scale_ref[...] + shift_ref[...], 0.0)  # BN + ReLU
        # Bilinear upsample of a 1x1 source (align_corners=True) == broadcast;
        # hoisted here so it runs once per (batch, split) chunk.
        ybc_ref[...] = jnp.broadcast_to(y, ybc_ref.shape).astype(ybc_ref.dtype)

    o_ref[0] = ybc_ref[...]


@functools.partial(jax.jit, static_argnames=("eps", "spatial_tile"))
def global_avg_pooling(x_nchw, weight, gamma, beta, running_mean, running_var,
                       eps=1e-5, spatial_tile=None):
    """x_nchw: (B, Cin, H, W); weight: (Cout, Cin) (Conv2d 1x1 weight squeezed);
    gamma/beta/running_mean/running_var: (Cout,) BatchNorm params (eval mode).
    `spatial_tile` is a static test/tuning override (multiple of 128 or == H*W)."""
    B, Cin, H, W = x_nchw.shape
    Cout = weight.shape[0]
    N = H * W
    out_dtype = x_nchw.dtype

    x_bcn = x_nchw.reshape(B, Cin, N)    # free reshape, keeps NCHW-major layout

    # Fold inference-mode BatchNorm into per-channel scale/shift.
    # TODO(synk): training-mode BatchNorm (batch-statistic updates) not implemented.
    inv_std = 1.0 / jnp.sqrt(running_var.astype(jnp.float32) + eps)
    scale = (gamma.astype(jnp.float32) * inv_std).reshape(Cout, 1)
    shift = (beta.astype(jnp.float32)
             - running_mean.astype(jnp.float32) * gamma.astype(jnp.float32) * inv_std
             ).reshape(Cout, 1)
    w = weight.reshape(Cout, Cin).astype(jnp.float32)

    block_budget, vmem_limit = _vmem_budgets()
    in_itemsize = jnp.dtype(x_nchw.dtype).itemsize
    out_itemsize = jnp.dtype(out_dtype).itemsize

    if spatial_tile is not None:
        assert spatial_tile % 128 == 0 or spatial_tile == N, "bad spatial_tile"
        tn_in = tn_out = spatial_tile
    else:
        # Pass 1 unrolls one VPU add per 128-lane chunk -> cap the unroll depth.
        tn_in = _pick_spatial_tile(N, Cin, in_itemsize, block_budget, max_lanes=8192)
        tn_out = _pick_spatial_tile(N, Cout, out_itemsize, block_budget, max_lanes=65536)

    # ---- Pass 1: spatially tiled global-sum reduction -> per-split partials.
    t_in = pl.cdiv(N, tn_in)
    nsplit = 2 if (t_in % 2 == 0 and t_in >= 2) else 1   # feeds both v7x TCs at small B
    tp_in = t_in // nsplit
    needs_mask = (N % tn_in) != 0

    psums = pl.pallas_call(
        functools.partial(_gap_partial_sum_kernel, tiles_per_split=tp_in,
                          tn=tn_in, n_total=N, needs_mask=needs_mask),
        out_shape=jax.ShapeDtypeStruct((B, nsplit, Cin, 1), jnp.float32),
        grid_spec=pltpu.PrefetchScalarGridSpec(
            num_scalar_prefetch=0,
            grid=(B, nsplit, tp_in),
            in_specs=[
                # Single streaming input; pipeline_mode=pl.Buffered(3) could be
                # swept here if a bundle dump ever shows exposed DMA waits.
                pl.BlockSpec((1, Cin, tn_in),
                             lambda b, s, j: (b, 0, s * tp_in + j)),
            ],
            out_specs=pl.BlockSpec((1, 1, Cin, 1), lambda b, s, j: (b, s, 0, 0)),
            scratch_shapes=[pltpu.VMEM((Cin, 128), jnp.float32)],
        ),
        compiler_params=pltpu.CompilerParams(
            dimension_semantics=("parallel", "parallel", "arbitrary"),
            vmem_limit_bytes=vmem_limit),
    )(x_bcn)

    # ---- Pass 2: combine + 1x1 conv + BN + ReLU (hoisted) -> lane-dense broadcast.
    t_out = pl.cdiv(N, tn_out)
    nsplit_out = 2 if (t_out % 2 == 0 and t_out >= 2) else 1
    tp_out = t_out // nsplit_out

    out_bcn = pl.pallas_call(
        functools.partial(_combine_broadcast_kernel, inv_n=1.0 / N),
        out_shape=jax.ShapeDtypeStruct((B, Cout, N), out_dtype),
        grid_spec=pltpu.PrefetchScalarGridSpec(
            num_scalar_prefetch=0,
            grid=(B, nsplit_out, tp_out),
            in_specs=[
                pl.BlockSpec((1, nsplit, Cin, 1), lambda b, s, j: (b, 0, 0, 0)),
                pl.BlockSpec((Cout, Cin), lambda b, s, j: (0, 0)),
                pl.BlockSpec((Cout, 1), lambda b, s, j: (0, 0)),
                pl.BlockSpec((Cout, 1), lambda b, s, j: (0, 0)),
            ],
            out_specs=pl.BlockSpec((1, Cout, tn_out),
                                   lambda b, s, j: (b, 0, s * tp_out + j)),
            scratch_shapes=[pltpu.VMEM((Cout, tn_out), out_dtype)],
        ),
        compiler_params=pltpu.CompilerParams(
            dimension_semantics=("parallel", "parallel", "arbitrary"),
            vmem_limit_bytes=vmem_limit),
    )(psums, w, scale, shift)

    return out_bcn.reshape(B, Cout, H, W)


def _reference(x, weight, gamma, beta, running_mean, running_var, eps=1e-5):
    """Pure-JAX reference mirroring the PyTorch forward (eval-mode BatchNorm)."""
    B, Cin, H, W = x.shape
    Cout = weight.shape[0]
    pooled = jnp.mean(x.astype(jnp.float32), axis=(2, 3))     # AdaptiveAvgPool2d(1)
    proj = pooled @ weight.reshape(Cout, Cin).T               # Conv2d 1x1, bias=False
    y = (proj - running_mean) / jnp.sqrt(running_var + eps) * gamma + beta
    y = jnp.maximum(y, 0.0)                                   # ReLU
    # F.interpolate of a 1x1 map (bilinear, align_corners=True) == broadcast.
    return jnp.broadcast_to(y[:, :, None, None], (B, Cout, H, W)).astype(x.dtype)


if __name__ == "__main__":
    root = jax.random.PRNGKey(0)

    def make_case(key, B, Cin, Cout, H, W, dtype):
        k = jax.random.split(key, 6)
        x = jax.random.normal(k[0], (B, Cin, H, W), jnp.float32).astype(dtype)
        weight = jax.random.normal(k[1], (Cout, Cin), jnp.float32) * 0.1
        gamma = 1.0 + 0.1 * jax.random.normal(k[2], (Cout,), jnp.float32)
        beta = 0.1 * jax.random.normal(k[3], (Cout,), jnp.float32)
        mean = 0.1 * jax.random.normal(k[4], (Cout,), jnp.float32)
        var = jax.random.uniform(k[5], (Cout,), jnp.float32, minval=0.5, maxval=1.5)
        return x, weight, gamma, beta, mean, var

    keys = jax.random.split(root, 4)

    # 1) Main case (small shapes, f32).
    args = make_case(keys[0], 2, 32, 16, 16, 16, jnp.float32)
    out = global_avg_pooling(*args)
    jax.block_until_ready(out)
    ref = _reference(*args)
    assert out.shape == ref.shape
    assert jnp.allclose(out, ref, atol=1e-4, rtol=1e-4), "mismatch (main case)"

    # 2) Multi-tile + 2-way spatial split path (forced 128-wide tiles, B=1).
    args = make_case(keys[1], 1, 16, 8, 16, 16, jnp.float32)   # N=256 -> 2 tiles
    out = global_avg_pooling(*args, spatial_tile=128)
    jax.block_until_ready(out)
    assert jnp.allclose(out, _reference(*args), atol=1e-4, rtol=1e-4), "mismatch (split)"

    # 3) Masked cdiv tiling path (H*W not a multiple of the tile).
    args = make_case(keys[2], 2, 24, 8, 18, 18, jnp.float32)   # N=324 -> 3 tiles, masked
    out = global_avg_pooling(*args, spatial_tile=128)
    jax.block_until_ready(out)
    assert jnp.allclose(out, _reference(*args), atol=1e-4, rtol=1e-4), "mismatch (mask)"

    # 4) bf16 activations (dtype-aware tiling, bf16 output path).
    args = make_case(keys[3], 1, 32, 16, 16, 16, jnp.bfloat16)
    out = global_avg_pooling(*args)
    jax.block_until_ready(out)
    ref = _reference(*args)
    assert jnp.allclose(out.astype(jnp.float32), ref.astype(jnp.float32),
                        atol=3e-2, rtol=3e-2), "mismatch (bf16)"

    print("KERNEL_OK")
</pallas_src>

<mosaic_0001>
module attributes {stable_mosaic.version = 11 : i64} {
  func.func @_gap_partial_sum_kernel(%arg0: i32, %arg1: i32, %arg2: i32, %arg3: memref<1x32x256xf32, #tpu.memory_space<vmem>>, %arg4: memref<1x1x32x1xf32, #tpu.memory_space<vmem>>, %arg5: memref<32x128xf32, #tpu.memory_space<vmem>>) attributes {dimension_semantics = [#tpu.dimension_semantics<parallel>, #tpu.dimension_semantics<parallel>, #tpu.dimension_semantics<arbitrary>], iteration_bounds = array<i64: 2, 1, 1>, scalar_prefetch = 0 : i64, scratch_operands = 1 : i64, tpu.core_type = #tpu.core_type<tc>, window_params = [{transform_indices = @transform_0, window_bounds = array<i64: 1, 32, 256>}, {transform_indices = @transform_1, window_bounds = array<i64: 1, 1, 32, 1>}]} {
    %c0_i32 = arith.constant 0 : i32
    %0 = arith.cmpi eq, %arg2, %c0_i32 : i32
    %1 = arith.extui %0 : i1 to i32
    %c0_i32_0 = arith.constant 0 : i32
    %2 = arith.cmpi ne, %1, %c0_i32_0 : i32
    scf.if %2 {
      %cst = arith.constant 0.000000e+00 : f32
      %16 = vector.broadcast %cst : f32 to vector<32x128xf32>
      %c0_15 = arith.constant 0 : index
      %c0_16 = arith.constant 0 : index
      %17 = vector.load %arg5[%c0_15, %c0_16] : memref<32x128xf32, #tpu.memory_space<vmem>>, vector<32x128xf32>
      tpu.vector_store %arg5[%c0_15, %c0_16], %16 {strides = array<i32>} : memref<32x128xf32, #tpu.memory_space<vmem>>, vector<32x128xf32>,
    } else {
    }
    %c0 = arith.constant 0 : index
    %c0_1 = arith.constant 0 : index
    %c0_2 = arith.constant 0 : index
    %3 = vector.load %arg3[%c0, %c0_1, %c0_2] : memref<1x32x256xf32, #tpu.memory_space<vmem>>, vector<1x32x128xf32>
    %4 = vector.shape_cast %3 : vector<1x32x128xf32> to vector<32x128xf32>
    %c0_3 = arith.constant 0 : index
    %c0_4 = arith.constant 0 : index
    %5 = vector.load %arg5[%c0_3, %c0_4] : memref<32x128xf32, #tpu.memory_space<vmem>>, vector<32x128xf32>
    %6 = arith.addf %5, %4 : vector<32x128xf32>
    %c0_5 = arith.constant 0 : index
    %c0_6 = arith.constant 0 : index
    %7 = vector.load %arg5[%c0_5, %c0_6] : memref<32x128xf32, #tpu.memory_space<vmem>>, vector<32x128xf32>
    tpu.vector_store %arg5[%c0_5, %c0_6], %6 {strides = array<i32>} : memref<32x128xf32, #tpu.memory_space<vmem>>, vector<32x128xf32>,
    %c0_7 = arith.constant 0 : index
    %c0_8 = arith.constant 0 : index
    %c128 = arith.constant 128 : index
    %8 = vector.load %arg3[%c0_7, %c0_8, %c128] : memref<1x32x256xf32, #tpu.memory_space<vmem>>, vector<1x32x128xf32>
    %9 = vector.shape_cast %8 : vector<1x32x128xf32> to vector<32x128xf32>
    %c0_9 = arith.constant 0 : index
    %c0_10 = arith.constant 0 : index
    %10 = vector.load %arg5[%c0_9, %c0_10] : memref<32x128xf32, #tpu.memory_space<vmem>>, vector<32x128xf32>
    %11 = arith.addf %10, %9 : vector<32x128xf32>
    %c0_11 = arith.constant 0 : index
    %c0_12 = arith.constant 0 : index
    %12 = vector.load %arg5[%c0_11, %c0_12] : memref<32x128xf32, #tpu.memory_space<vmem>>, vector<32x128xf32>
    tpu.vector_store %arg5[%c0_11, %c0_12], %11 {strides = array<i32>} : memref<32x128xf32, #tpu.memory_space<vmem>>, vector<32x128xf32>,
    %c0_i32_13 = arith.constant 0 : i32
    %13 = arith.cmpi eq, %arg2, %c0_i32_13 : i32
    %14 = arith.extui %13 : i1 to i32
    %c0_i32_14 = arith.constant 0 : i32
    %15 = arith.cmpi ne, %14, %c0_i32_14 : i32
    scf.if %15 {
      %c0_15 = arith.constant 0 : index
      %c0_16 = arith.constant 0 : index
      %16 = vector.load %arg5[%c0_15, %c0_16] : memref<32x128xf32, #tpu.memory_space<vmem>>, vector<32x128xf32>
      %cst = arith.constant dense<0.000000e+00> : vector<32xf32>
      %17 = vector.multi_reduction <add>, %16, %cst [1] : vector<32x128xf32> to vector<32xf32>
      %18 = vector.shape_cast %17 : vector<32xf32> to vector<32x1xf32>
      %c0_17 = arith.constant 0 : index
      %c0_18 = arith.constant 0 : index
      %c0_19 = arith.constant 0 : index
      %c0_20 = arith.constant 0 : index
      %19 = vector.load %arg4[%c0_17, %c0_18, %c0_19, %c0_20] : memref<1x1x32x1xf32, #tpu.memory_space<vmem>>, vector<1x1x32x1xf32>
      %20 = vector.shape_cast %19 : vector<1x1x32x1xf32> to vector<32x1xf32>
      %21 = vector.shape_cast %18 : vector<32x1xf32> to vector<1x1x32x1xf32>
      tpu.vector_store %arg4[%c0_17, %c0_18, %c0_19, %c0_20], %21 {strides = array<i32>} : memref<1x1x32x1xf32, #tpu.memory_space<vmem>>, vector<1x1x32x1xf32>,
    } else {
    }
    return
  }
  func.func @transform_0(%arg0: i32, %arg1: i32, %arg2: i32) -> (i32, i32, i32) {
    %c1_i32 = arith.constant 1 : i32
    %0 = arith.muli %arg1, %c1_i32 : i32
    %1 = arith.addi %0, %arg2 : i32
    %c0_i32 = arith.constant 0 : i32
    %c0_i32_0 = arith.constant 0 : i32
    return %arg0, %c0_i32, %1 : i32, i32, i32
  }
  func.func @transform_1(%arg0: i32, %arg1: i32, %arg2: i32) -> (i32, i32, i32, i32) {
    %c0_i32 = arith.constant 0 : i32
    %c0_i32_0 = arith.constant 0 : i32
    %c0_i32_1 = arith.constant 0 : i32
    return %arg0, %arg1, %c0_i32, %c0_i32_0 : i32, i32, i32, i32
  }
}

module attributes {stable_mosaic.version = 11 : i64} {
  func.func @_combine_broadcast_kernel(%arg0: i32, %arg1: i32, %arg2: i32, %arg3: memref<1x1x32x1xf32, #tpu.memory_space<vmem>>, %arg4: memref<16x32xf32, #tpu.memory_space<vmem>>, %arg5: memref<16x1xf32, #tpu.memory_space<vmem>>, %arg6: memref<16x1xf32, #tpu.memory_space<vmem>>, %arg7: memref<1x16x256xf32, #tpu.memory_space<vmem>>, %arg8: memref<16x256xf32, #tpu.memory_space<vmem>>) attributes {dimension_semantics = [#tpu.dimension_semantics<parallel>, #tpu.dimension_semantics<parallel>, #tpu.dimension_semantics<arbitrary>], iteration_bounds = array<i64: 2, 1, 1>, scalar_prefetch = 0 : i64, scratch_operands = 1 : i64, tpu.core_type = #tpu.core_type<tc>, window_params = [{transform_indices = @transform_0, window_bounds = array<i64: 1, 1, 32, 1>}, {pipeline_mode = #tpu.pipeline_mode<synchronous>, transform_indices = @transform_1, window_bounds = array<i64: 16, 32>}, {pipeline_mode = #tpu.pipeline_mode<synchronous>, transform_indices = @transform_2, window_bounds = array<i64: 16, 1>}, {pipeline_mode = #tpu.pipeline_mode<synchronous>, transform_indices = @transform_3, window_bounds = array<i64: 16, 1>}, {transform_indices = @transform_4, window_bounds = array<i64: 1, 16, 256>}]} {
    %c0_i32 = arith.constant 0 : i32
    %0 = arith.cmpi eq, %arg2, %c0_i32 : i32
    %1 = arith.extui %0 : i1 to i32
    %c0_i32_0 = arith.constant 0 : i32
    %2 = arith.cmpi ne, %1, %c0_i32_0 : i32
    scf.if %2 {
      %c0_5 = arith.constant 0 : index
      %c0_6 = arith.constant 0 : index
      %c0_7 = arith.constant 0 : index
      %c0_8 = arith.constant 0 : index
      %7 = vector.load %arg3[%c0_5, %c0_6, %c0_7, %c0_8] : memref<1x1x32x1xf32, #tpu.memory_space<vmem>>, vector<1x1x32x1xf32>
      %8 = vector.shape_cast %7 : vector<1x1x32x1xf32> to vector<32x1xf32>
      %cst = arith.constant 3.906250e-03 : f32
      %9 = vector.broadcast %cst : f32 to vector<32x1xf32>
      %10 = arith.mulf %8, %9 : vector<32x1xf32>
      %c0_9 = arith.constant 0 : index
      %c0_10 = arith.constant 0 : index
      %11 = vector.load %arg4[%c0_9, %c0_10] : memref<16x32xf32, #tpu.memory_space<vmem>>, vector<16x32xf32>
      %cst_11 = arith.constant dense<0.000000e+00> : vector<16x1xf32>
      %12 = tpu.matmul %11, %10, %cst_11 {dimension_numbers = #tpu.dot_dimension_numbers<[1], [0], [0], [1], [0, 0, 1, 1], [], []>} : vector<16x32xf32>, vector<32x1xf32>, vector<16x1xf32> -> vector<16x1xf32>
      %c0_12 = arith.constant 0 : index
      %c0_13 = arith.constant 0 : index
      %13 = vector.load %arg5[%c0_12, %c0_13] : memref<16x1xf32, #tpu.memory_space<vmem>>, vector<16x1xf32>
      %14 = arith.mulf %12, %13 : vector<16x1xf32>
      %c0_14 = arith.constant 0 : index
      %c0_15 = arith.constant 0 : index
      %15 = vector.load %arg6[%c0_14, %c0_15] : memref<16x1xf32, #tpu.memory_space<vmem>>, vector<16x1xf32>
      %16 = arith.addf %14, %15 : vector<16x1xf32>
      %cst_16 = arith.constant 0.000000e+00 : f32
      %17 = vector.broadcast %cst_16 : f32 to vector<16x1xf32>
      %18 = arith.maximumf %16, %17 : vector<16x1xf32>
      %19 = vector.shape_cast %18 : vector<16x1xf32> to vector<16x1xf32>
      %20 = vector.broadcast %19 : vector<16x1xf32> to vector<16x256xf32>
      %c0_17 = arith.constant 0 : index
      %c0_18 = arith.constant 0 : index
      %21 = vector.load %arg8[%c0_17, %c0_18] : memref<16x256xf32, #tpu.memory_space<vmem>>, vector<16x256xf32>
      tpu.vector_store %arg8[%c0_17, %c0_18], %20 {strides = array<i32>} : memref<16x256xf32, #tpu.memory_space<vmem>>, vector<16x256xf32>,
    } else {
    }
    %c0 = arith.constant 0 : index
    %c0_1 = arith.constant 0 : index
    %3 = vector.load %arg8[%c0, %c0_1] : memref<16x256xf32, #tpu.memory_space<vmem>>, vector<16x256xf32>
    %c0_2 = arith.constant 0 : index
    %c0_3 = arith.constant 0 : index
    %c0_4 = arith.constant 0 : index
    %4 = vector.load %arg7[%c0_2, %c0_3, %c0_4] : memref<1x16x256xf32, #tpu.memory_space<vmem>>, vector<1x16x256xf32>
    %5 = vector.shape_cast %4 : vector<1x16x256xf32> to vector<16x256xf32>
    %6 = vector.shape_cast %3 : vector<16x256xf32> to vector<1x16x256xf32>
    tpu.vector_store %arg7[%c0_2, %c0_3, %c0_4], %6 {strides = array<i32>} : memref<1x16x256xf32, #tpu.memory_space<vmem>>, vector<1x16x256xf32>,
    return
  }
  func.func @transform_0(%arg0: i32, %arg1: i32, %arg2: i32) -> (i32, i32, i32, i32) {
    %c0_i32 = arith.constant 0 : i32
    %c0_i32_0 = arith.constant 0 : i32
    %c0_i32_1 = arith.constant 0 : i32
    %c0_i32_2 = arith.constant 0 : i32
    return %arg0, %c0_i32, %c0_i32_0, %c0_i32_1 : i32, i32, i32, i32
  }
  func.func @transform_1(%arg0: i32, %arg1: i32, %arg2: i32) -> (i32, i32) {
    %c0_i32 = arith.constant 0 : i32
    %c0_i32_0 = arith.constant 0 : i32
    %c0_i32_1 = arith.constant 0 : i32
    return %c0_i32, %c0_i32_0 : i32, i32
  }
  func.func @transform_2(%arg0: i32, %arg1: i32, %arg2: i32) -> (i32, i32) {
    %c0_i32 = arith.constant 0 : i32
    %c0_i32_0 = arith.constant 0 : i32
    %c0_i32_1 = arith.constant 0 : i32
    return %c0_i32, %c0_i32_0 : i32, i32
  }
  func.func @transform_3(%arg0: i32, %arg1: i32, %arg2: i32) -> (i32, i32) {
    %c0_i32 = arith.constant 0 : i32
    %c0_i32_0 = arith.constant 0 : i32
    %c0_i32_1 = arith.constant 0 : i32
    return %c0_i32, %c0_i32_0 : i32, i32
  }
  func.func @transform_4(%arg0: i32, %arg1: i32, %arg2: i32) -> (i32, i32, i32) {
    %c1_i32 = arith.constant 1 : i32
    %0 = arith.muli %arg1, %c1_i32 : i32
    %1 = arith.addi %0, %arg2 : i32
    %c0_i32 = arith.constant 0 : i32
    %c0_i32_0 = arith.constant 0 : i32
    return %arg0, %c0_i32, %1 : i32, i32, i32
  }
}

</mosaic_0001>

<bundles_post_ra>
// kernel: global_avg_pooling.2
= control target key start
LH: loop header
LB: loop body
LE: loop exit
PB: predicated region body
PF: predicated region fallthrough
CT: control target
= control target key end

     0   :  { %s392_s6 = smov 0   ;;  %s394_s7 = smov 0   ;;  %s425_s0 = inlined_call_operand.vmem [shape: f32[2,32,256], index: 0, kind: input, shape index: {}]   ;;  %s426_s1 = inlined_call_operand.vmem [shape: f32[2,1,32,1], index: 1, kind: output, shape index: {}]  }
   0x1   :  { %s396_s8 = smov 0  }
   0x2 LB: > { %s30_s9 = sadd.s32 1, %s376_s7  ;;  %p325_p0 = scmp.ge.s32.totalorder %s380_s8, 1  ;;  %s380_s8 = sphi %s396_s8, %s11_s8   ;;  %s376_s7 = sphi %s394_s7, %s428_s7   ;;  %s372_s6 = sphi %s392_s6, %s427_s6  }
   0x3   : > { %p32_p1 = scmp.ge.s32.totalorder %s30_s9, 2  ;;  %p119_p2 = scmp.lt.s32.totalorder %s380_s8, 3 }
   0x5   : > { %s430_s9 = smov (%p32_p1, %s30_s9), 0  ;;  %p120_p3 = pnand %p325_p0, %p119_p2 }
   0x6   : > { %p150_p4 = scmp.lt.s32.totalorder (!%p120_p3), %s372_s6, 1 }
   0x7   : > { %123 = sbr.rel (%p120_p3) target bundleno = 162 (0xa2), region = 24 }
   0xc   : > { %s432_s6 = smov (!%p150_p4, %s372_s6), 1  ;;  %vm224_vm0 = vcmask 7168  }
   0xd   : > { %s332_s10 = sshll.u32 %s432_s6, 6  ;;  %s333_s14 = sshll.u32 %s432_s6, 5 }
   0xe   : > { %s157_s13 = scalar_lea.vmem %s425_s0, %s332_s10  ;;  %s168_s17 = scalar_lea.vmem %s426_s1, %s333_s14 }
   0xf   : > { %v179_v0 = vld [vmem:[%s157_s13 + $0x20] sm:$0xff]  ;;  %v195_v1 = vld [vmem:[%s157_s13 + $0x28] sm:$0xff]  ;;  %v180_v5 = vld [vmem:[%s157_s13 + $0x30] sm:$0xff] }
  0x10   : > { %v177_v2 = vld [vmem:[%s157_s13] sm:$0xff]  ;;  %v203_v3 = vadd.f32 %v195_v1, %v179_v0  ;;  %v193_v4 = vld [vmem:[%s157_s13 + $0x8] sm:$0xff]  ;;  %v196_v6 = vld [vmem:[%s157_s13 + $0x38] sm:$0xff] }
  0x11   : > { %v201_v7 = vadd.f32 %v193_v4, %v177_v2  ;;  %v178_v8 = vld [vmem:[%s157_s13 + $0x10] sm:$0xff]  ;;  %v194_v9 = vld [vmem:[%s157_s13 + $0x18] sm:$0xff]  ;;  %v204_v10 = vadd.f32 %v196_v6, %v180_v5 }
  0x12   : > { %220 = vadd.xlane.f32.xlu1 %v203_v3  ;;  %v202_v11 = vadd.f32 %v194_v9, %v178_v8 }
  0x13   : > { %216 = vadd.xlane.f32.xlu0 %v201_v7 }
  0x16   : > { %222 = vadd.xlane.f32.xlu1 %v204_v10 }
  0x17   : > { %218 = vadd.xlane.f32.xlu0 %v202_v11 }
  0x9b   : > { %v221_v12 = vpop.xlane.xlu1 %220 }
  0x9c   : > { %227 = vst.msk [vmem:[%s168_s17 + $0x10] sm:$0xff] %vm224_vm0, %v221_v12  ;;  %v217_v13 = vpop.xlane.xlu0 %216 }
  0x9d   : > { %225 = vst.msk [vmem:[%s168_s17] sm:$0xff] %vm224_vm0, %v217_v13 }
  0x9f   : > { %v223_v14 = vpop.xlane.xlu1 %222 }
  0xa0   : > { %228 = vst.msk [vmem:[%s168_s17 + $0x18] sm:$0xff] %vm224_vm0, %v223_v14  ;;  %v219_v15 = vpop.xlane.xlu0 %218 }
  0xa1   : > { %226 = vst.msk [vmem:[%s168_s17 + $0x8] sm:$0xff] %vm224_vm0, %v219_v15 }
  0xa2 PF: > { %s11_s8 = sadd.s32 1, %s380_s8   ;;  %s427_s6 = smov %s376_s7 }
  0xa3   : > { %p8_p5 = scmp.ge.s32.totalorder %s11_s8, 4   ;;  %s428_s7 = smov %s430_s9 }
  0xa5   :  { %10 = sbr.rel (!%p8_p5) target bundleno = 2 (0x2), region = 62 }

// kernel: global_avg_pooling.3
= control target key start
LH: loop header
LB: loop body
LE: loop exit
PB: predicated region body
PF: predicated region fallthrough
CT: control target
= control target key end

     0   :  { %s556_s15 = smov 0   ;;  %s558_s16 = smov 0   ;;  %s616_s0 = inlined_call_operand.vmem [shape: f32[2,1,32,1], index: 0, kind: input, shape index: {}]   ;;  %s617_s1 = inlined_call_operand.vmem [shape: f32[16,32], index: 1, kind: input, shape index: {}]   ;;  %s618_s2 = inlined_call_operand.vmem [shape: f32[16,1], index: 2, kind: input, shape index: {}]   ;;  %s619_s3 = inlined_call_operand.vmem [shape: f32[16,1], index: 3, kind: input, shape index: {}]   ;;  %s620_s4 = inlined_call_operand.vmem [shape: f32[2,16,256], index: 4, kind: output, shape index: {}]  }
   0x1   :  { %s560_s17 = smov 0  }
   0x2 LB: > { %s33_s18 = sadd.s32 1, %s524_s16  ;;  %p452_p0 = scmp.ge.s32.totalorder %s528_s17, 1  ;;  %s528_s17 = sphi %s560_s17, %s14_s17   ;;  %s524_s16 = sphi %s558_s16, %s622_s16   ;;  %s520_s15 = sphi %s556_s15, %s621_s15  }
   0x3   : > { %p35_p1 = scmp.ge.s32.totalorder %s33_s18, 2  ;;  %p185_p2 = scmp.lt.s32.totalorder %s528_s17, 3 }
   0x5   : > { %s624_s18 = smov (%p35_p1, %s33_s18), 0  ;;  %p186_p3 = pnand %p452_p0, %p185_p2 }
   0x6   : > { %p216_p4 = scmp.lt.s32.totalorder (!%p186_p3), %s520_s15, 1 }
   0x7   : > { %189 = sbr.rel (%p186_p3) target bundleno = 356 (0x164), region = 36 }
   0xc   : > { %v245_v0 = vld [vmem:[%s617_s1] sm:$0xff]  ;;  %vm247_vm0 = vcmask 261120   ;;  %s626_s15 = smov (!%p216_p4, %s520_s15), 1  ;;  %v246_v9 = vld [vmem:[%s617_s1 + $0x8] sm:$0xff]  ;;  %v530_v10 = vmov 0  }
   0xd   : > { %477 = vmatprep.mubr.msk.f32.mxu0 %vm247_vm0, %v245_v0  ;;  %s461_s21 = sshll.u32 %s626_s15, 5  ;;  %505 = vset.pattern.permute.xlu0 %v530_v10  ;;  %v330_v12 = vld [vmem:[%s618_s2 + $0x8] sm:$0xff]  ;;  %v329_v13 = vld [vmem:[%s618_s2] sm:$0xff] }
   0xe   : > { %s220_s24 = scalar_lea.vmem %s616_s0, %s461_s21  ;;  %v333_v15 = vld [vmem:[%s619_s3] sm:$0xff]  ;;  %v334_v18 = vld [vmem:[%s619_s3 + $0x8] sm:$0xff]  ;;  %s230_s11 = scalar_lea.vmem %s620_s4, %s461_s21 }
   0xf   : > { %v240_v1 = vld [vmem:[%s220_s24 + $0x18] sm:$0xff]  ;;  %v239_v2 = vld [vmem:[%s220_s24 + $0x10] sm:$0xff]  ;;  %v238_v3 = vld [vmem:[%s220_s24 + $0x8] sm:$0xff] }
  0x10   : > { %v244_v4 = vmul.f32 0.00390625, %v240_v1  ;;  %v243_v5 = vmul.f32 0.00390625, %v239_v2  ;;  %v237_v6 = vld [vmem:[%s220_s24] sm:$0xff]  ;;  %v242_v7 = vmul.f32 0.00390625, %v238_v3 }
  0x11   : > { %v241_v8 = vmul.f32 0.00390625, %v237_v6 }
  0x12   : > { %469 = vmatprep.subr.mxu0 %v244_v4 }
  0x13   : > { %470 = vmatpush3.msra.mxu0 %v244_v4 }
  0x14   : > { %471 = vmatprep.subr.mxu0 %v243_v5 }
  0x15   : > { %472 = vmatpush3.msra.mxu0 %v243_v5 }
  0x16   : > { %473 = vmatprep.subr.mxu0 %v242_v7 }
  0x17   : > { %474 = vmatpush3.msra.mxu0 %v242_v7 }
  0x18   : > { %475 = vmatprep.subr.mxu0 %v241_v8 }
  0x19   : > { %476 = vmatpush3.msra.mxu0 %v241_v8 }
  0x1a   : > { %478 = vmatmul.mubr.msk.f32.vlgmr.msra.gmra.mxu0 %vm247_vm0, %v246_v9 }
  0xda   : > { %v479_v11 = vpop.f32.mrf.mxu0 }
  0xdb   : > { %v332_v16 = vmul.f32 %v479_v11, %v330_v12 }
  0xdc   : > { %v320_v14 = vpop.f32.mrf.mxu0 }
  0xdd   : > { %v331_v17 = vmul.f32 %v329_v13, %v320_v14  ;;  %v336_v20 = vadd.f32 %v334_v18, %v332_v16 }
  0xdf   : > { %v335_v19 = vadd.f32 %v333_v15, %v331_v17  ;;  %v338_v22 = vmax.f32 %v336_v20, 0.0 }
  0xe1   : > { %v337_v21 = vmax.f32 %v335_v19, 0.0 }
  0xe3   : > { %341 = vperm.xlu0 %505, %v337_v21  }
  0xe7   : > { %346 = vperm.xlu0 %505, %v338_v22  }
 0x15e   : > { %v342_v23 = vpop.permute.xlu0 %341 }
 0x15f   : > { %357 = vst [vmem:[%s230_s11] sm:$0xff] %v342_v23  ;;  %358 = vst [vmem:[%s230_s11 + $0x8] sm:$0xff] %v342_v23 }
 0x162   : > { %v347_v24 = vpop.permute.xlu0 %346 }
 0x163   : > { %359 = vst [vmem:[%s230_s11 + $0x10] sm:$0xff] %v347_v24  ;;  %360 = vst [vmem:[%s230_s11 + $0x18] sm:$0xff] %v347_v24 }
 0x164 PF: > { %s14_s17 = sadd.s32 1, %s528_s17   ;;  %s621_s15 = smov %s524_s16 }
 0x165   : > { %p11_p5 = scmp.ge.s32.totalorder %s14_s17, 4   ;;  %s622_s16 = smov %s624_s18 }
 0x167   :  { %13 = sbr.rel (!%p11_p5) target bundleno = 2 (0x2), region = 70 }

</bundles_post_ra>
